<compile_context>
chip_gen: v7x
topology: tpu7x:2x2x1
jax: 0.10.0
libtpu: 0.0.40
codegen_flags: <defaults>
</compile_context>

<pallas_src>
import functools
import math

import jax
import jax.numpy as jnp
from jax.experimental import pallas as pl
from jax.experimental.pallas import tpu as pltpu


def _glu_kernel(x_ref, o_ref, *, slope):
    # x_ref: (bb, 2, tr, tl); chunk 0 = "out" half, chunk 1 = "gate" half.
    a = x_ref[:, 0]
    g = x_ref[:, 1]
    gated = jnp.where(g >= 0, g, jnp.asarray(slope, dtype=g.dtype) * g)
    o_ref[...] = (a * gated).astype(o_ref.dtype)


def _round_down(x, align):
    return max(align, (x // align) * align)


@functools.partial(jax.jit, static_argnames=("slope",))
def glu_activation(x, slope=0.3):
    """x: (B, 2C, *spatial).  Returns out * leaky_relu(gate, slope), chunk on dim 1."""
    B = x.shape[0]
    two_c = x.shape[1]
    assert two_c % 2 == 0, "channel dim must be even for GLU chunk(2, dim=1)"
    C = two_c // 2
    rest = x.shape[2:]
    T = int(math.prod(rest)) if rest else 1
    N = C * T
    itemsize = jnp.dtype(x.dtype).itemsize
    sub_align = max(8, 32 // itemsize)  # f32: 8, bf16: 16, int8/fp8: 32

    # ~2 MiB merged (out+gate) input block -> ~3 MiB HBM traffic per step and
    # ~6 MiB of double-buffered VMEM: fat enough to hide per-step overhead,
    # small enough for every chip's scoped-VMEM default (incl. v7x's 64 MiB).
    target_in_bytes = 2 * 1024 * 1024

    if N % 128 == 0:
        # Lane-dense view: each per-batch chunk slab is contiguous, so this
        # reshape is free and all stores are full-width (unmasked) vregs.
        R, L = N // 128, 128
    else:
        # Ragged tail: keep the natural (C, T) layout; Pallas masks the edges.
        R, L = C, T

    # Lane tile: full dim when small, else a multiple of 128 (tail masked).
    tl = L if L <= 2048 else _round_down(2048, 128)

    # Sublane tile from the byte budget (multiple of the dtype's sublane pack,
    # or the full dim).
    tr_budget = max(1, target_in_bytes // (2 * tl * itemsize))
    if tr_budget >= R:
        tr = R
    else:
        tr = min(_round_down(tr_budget, sub_align), R)

    # Batch folding: when one block already covers the whole per-batch slab but
    # is still tiny, fold several batches into each step.
    bb = 1
    if tr == R and tl == L and B > 1:
        per_batch_in_bytes = 2 * N * itemsize
        if per_batch_in_bytes < target_in_bytes:
            bb = min(B, max(1, target_in_bytes // per_batch_in_bytes))
    # Keep >= 2 grid steps when possible so both v7x TensorCores get work.
    if bb >= B and B > 1:
        bb = (B + 1) // 2

    grid = (pl.cdiv(B, bb), pl.cdiv(R, tr), pl.cdiv(L, tl))

    x4 = x.reshape(B, 2, R, L)
    kernel = functools.partial(_glu_kernel, slope=float(slope))

    out = pl.pallas_call(
        kernel,
        out_shape=jax.ShapeDtypeStruct((B, R, L), x.dtype),
        grid=grid,
        in_specs=[
            # Merged "out"+"gate" block: one DMA stream, chunk axis inside.
            pl.BlockSpec((bb, 2, tr, tl), lambda b, r, l: (b, 0, r, l)),
        ],
        out_specs=pl.BlockSpec((bb, tr, tl), lambda b, r, l: (b, r, l)),
        compiler_params=pltpu.CompilerParams(
            dimension_semantics=("parallel", "parallel", "parallel"),
        ),
        cost_estimate=pl.CostEstimate(
            flops=3 * B * N,            # select + 2 muls per output element
            transcendentals=0,
            bytes_accessed=3 * B * N * itemsize,
        ),
    )(x4)

    return out.reshape((B, C) + rest)


def _reference(x, slope):
    C = x.shape[1] // 2
    out = x[:, :C]
    gate = x[:, C:]
    return out * jnp.where(gate >= 0, gate, jnp.asarray(slope, x.dtype) * gate)


if __name__ == "__main__":
    slope = 0.3

    # Case 1: typical conv-feature shape (B, 2C, T) -> lane-dense path.
    x1 = jax.random.normal(jax.random.PRNGKey(0), (2, 8, 64), dtype=jnp.float32)
    o1 = jax.block_until_ready(glu_activation(x1, slope=slope))
    r1 = _reference(x1, slope)
    assert o1.shape == r1.shape and o1.dtype == x1.dtype
    assert jnp.allclose(o1, r1, atol=1e-6, rtol=1e-6), "f32 lane-dense mismatch"

    # Case 2: ragged spatial dims (C*T not a multiple of 128) -> fallback path.
    x2 = jax.random.normal(jax.random.PRNGKey(1), (2, 6, 3, 10), dtype=jnp.float32)
    o2 = jax.block_until_ready(glu_activation(x2, slope=slope))
    r2 = _reference(x2, slope)
    assert o2.shape == r2.shape
    assert jnp.allclose(o2, r2, atol=1e-6, rtol=1e-6), "ragged-path mismatch"

    # Case 3: bf16 input, computed natively in bf16 (no f32 upcast).
    x3 = x1.astype(jnp.bfloat16)
    o3 = jax.block_until_ready(glu_activation(x3, slope=slope))
    r3 = _reference(x3, slope)
    assert o3.dtype == jnp.bfloat16
    assert jnp.allclose(o3.astype(jnp.float32), r3.astype(jnp.float32),
                        atol=1e-2, rtol=1e-2), "bf16 mismatch"

    print("KERNEL_OK")
</pallas_src>

<mosaic_0001>
module attributes {stable_mosaic.version = 11 : i64} {
  func.func @_glu_kernel(%arg0: i32, %arg1: i32, %arg2: i32, %arg3: memref<1x2x2x128xf32, #tpu.memory_space<vmem>>, %arg4: memref<1x2x128xf32, #tpu.memory_space<vmem>>) attributes {dimension_semantics = [#tpu.dimension_semantics<parallel>, #tpu.dimension_semantics<parallel>, #tpu.dimension_semantics<parallel>], iteration_bounds = array<i64: 2, 1, 1>, scalar_prefetch = 0 : i64, scratch_operands = 0 : i64, tpu.core_type = #tpu.core_type<tc>, window_params = [{transform_indices = @transform_0, window_bounds = array<i64: 1, 2, 2, 128>}, {transform_indices = @transform_1, window_bounds = array<i64: 1, 2, 128>}]} {
    %c0 = arith.constant 0 : index
    %c0_0 = arith.constant 0 : index
    %c0_1 = arith.constant 0 : index
    %c0_2 = arith.constant 0 : index
    %0 = vector.load %arg3[%c0, %c0_0, %c0_1, %c0_2] : memref<1x2x2x128xf32, #tpu.memory_space<vmem>>, vector<1x1x2x128xf32>
    %1 = vector.shape_cast %0 : vector<1x1x2x128xf32> to vector<1x2x128xf32>
    %c0_3 = arith.constant 0 : index
    %c1 = arith.constant 1 : index
    %c0_4 = arith.constant 0 : index
    %c0_5 = arith.constant 0 : index
    %2 = vector.load %arg3[%c0_3, %c1, %c0_4, %c0_5] : memref<1x2x2x128xf32, #tpu.memory_space<vmem>>, vector<1x1x2x128xf32>
    %3 = vector.shape_cast %2 : vector<1x1x2x128xf32> to vector<1x2x128xf32>
    %cst = arith.constant 0.000000e+00 : f32
    %4 = vector.broadcast %cst : f32 to vector<1x2x128xf32>
    %5 = arith.cmpf oge, %3, %4 : vector<1x2x128xf32>
    %cst_6 = arith.constant 3.000000e-01 : f32
    %6 = vector.broadcast %cst_6 : f32 to vector<1x2x128xf32>
    %7 = arith.mulf %6, %3 : vector<1x2x128xf32>
    %8 = arith.select %5, %3, %7 : vector<1x2x128xi1>, vector<1x2x128xf32>
    %9 = arith.mulf %1, %8 : vector<1x2x128xf32>
    %c0_7 = arith.constant 0 : index
    %c0_8 = arith.constant 0 : index
    %c0_9 = arith.constant 0 : index
    %10 = vector.load %arg4[%c0_7, %c0_8, %c0_9] : memref<1x2x128xf32, #tpu.memory_space<vmem>>, vector<1x2x128xf32>
    tpu.vector_store %arg4[%c0_7, %c0_8, %c0_9], %9 {strides = array<i32>} : memref<1x2x128xf32, #tpu.memory_space<vmem>>, vector<1x2x128xf32>,
    return
  }
  func.func @transform_0(%arg0: i32, %arg1: i32, %arg2: i32) -> (i32, i32, i32, i32) {
    %c0_i32 = arith.constant 0 : i32
    %c0_i32_0 = arith.constant 0 : i32
    return %arg0, %c0_i32, %arg1, %arg2 : i32, i32, i32, i32
  }
  func.func @transform_1(%arg0: i32, %arg1: i32, %arg2: i32) -> (i32, i32, i32) {
    %c0_i32 = arith.constant 0 : i32
    return %arg0, %arg1, %arg2 : i32, i32, i32
  }
}

</mosaic_0001>

<bundles_post_ra>
// kernel: glu_activation.1
= control target key start
LH: loop header
LB: loop body
LE: loop exit
PB: predicated region body
PF: predicated region fallthrough
CT: control target
= control target key end

     0   :  { %s343_s6 = smov 0   ;;  %s345_s7 = smov 0   ;;  %s364_s0 = inlined_call_operand.vmem [shape: f32[2,2,2,128], index: 0, kind: input, shape index: {}]   ;;  %s365_s1 = inlined_call_operand.vmem [shape: f32[2,2,128], index: 1, kind: output, shape index: {}]  }
   0x1   :  { %s347_s8 = smov 0  }
   0x2 LB: > { %s30_s9 = sadd.s32 1, %s327_s7  ;;  %p277_p0 = scmp.ge.s32.totalorder %s331_s8, 1  ;;  %s331_s8 = sphi %s347_s8, %s11_s8   ;;  %s327_s7 = sphi %s345_s7, %s367_s7   ;;  %s323_s6 = sphi %s343_s6, %s366_s6  }
   0x3   : > { %p32_p1 = scmp.ge.s32.totalorder %s30_s9, 2  ;;  %p120_p2 = scmp.lt.s32.totalorder %s331_s8, 3 }
   0x5   : > { %s369_s9 = smov (%p32_p1, %s30_s9), 0  ;;  %p121_p3 = pnand %p277_p0, %p120_p2 }
   0x6   : > { %p151_p4 = scmp.lt.s32.totalorder (!%p121_p3), %s323_s6, 1 }
   0x7   : > { %124 = sbr.rel (%p121_p3) target bundleno = 24 (0x18), region = 24 }
   0xe   : > { %s371_s6 = smov (!%p151_p4, %s323_s6), 1 }
   0xf   : > { %s284_s10 = sshll.u32 %s371_s6, 2  ;;  %s280_s14 = sshll.u32 %s371_s6, 1 }
  0x10   : > { %s161_s13 = scalar_lea.vmem %s364_s0, %s284_s10  ;;  %s171_s17 = scalar_lea.vmem %s365_s1, %s280_s14 }
  0x11   : > { %v281_v0 = vld [vmem:[%s161_s13 + $0x2] sm:$0x3]  ;;  %v172_v1 = vld [vmem:[%s161_s13] sm:$0x3] }
  0x12   : > { %vm175_vm0 = vcmp.ge.f32.partialorder %v281_v0, 0.0  ;;  %v176_v2 = vmul.f32 0.3, %v281_v0 }
  0x14   : > { %v177_v3 = vsel %vm175_vm0, %v281_v0, %v176_v2 }
  0x15   : > { %v178_v4 = vmul.f32 %v177_v3, %v172_v1 }
  0x17   : > { %179 = vst [vmem:[%s171_s17] sm:$0x3] %v178_v4 }
  0x18 PF: > { %s11_s8 = sadd.s32 1, %s331_s8   ;;  %s366_s6 = smov %s327_s7 }
  0x19   : > { %p8_p5 = scmp.ge.s32.totalorder %s11_s8, 4   ;;  %s367_s7 = smov %s369_s9 }
  0x1b   :  { %10 = sbr.rel (!%p8_p5) target bundleno = 2 (0x2), region = 55 }

</bundles_post_ra>
